<compile_context>
chip_gen: v5e
topology: v5e:2x2
jax: 0.10.0
libtpu: 0.0.40
codegen_flags: <defaults>
</compile_context>

<pallas_src>
import functools

import jax
import jax.numpy as jnp
from jax.experimental import pallas as pl
from jax.experimental.pallas import tpu as pltpu


_VMEM_WORKING_SET_BYTES = 24 * 1024 * 1024   # target resident working set
_VMEM_LIMIT_BYTES = 48 * 1024 * 1024         # scoped-VMEM limit (< 64 MiB v7x)


def _radix_softmax_kernel(x_ref, o_ref, *, radix, cardinality, rest):
    """One row tile.

    x_ref / o_ref: (TB, C) blocks, C = cardinality * radix * rest.
      input  layout (torch .view):            in[:, (c*radix + r)*rest + t]
      output layout (after .transpose(1,2)):  out[:, (r*cardinality + c)*rest + t]
    The softmax over `radix` is unrolled (radix is 2 or 4 in SplAt) into pure
    elementwise VPU max/exp/add on (TB, rest) slabs; the permuted output row
    is assembled in registers and stored with ONE dense full-block write.
    """
    x = x_ref[...].astype(jnp.float32)            # single dense block load
    out_slabs = [None] * (radix * cardinality)    # output-order collection
    for c in range(cardinality):
        base = c * radix
        slabs = [x[:, (base + r) * rest:(base + r + 1) * rest]
                 for r in range(radix)]
        m = slabs[0]
        for r in range(1, radix):
            m = jnp.maximum(m, slabs[r])
        exps = [jnp.exp(s - m) for s in slabs]
        denom = exps[0]
        for r in range(1, radix):
            denom = denom + exps[r]
        # Exact reciprocal: approx=True's ~2^-12 error would not reliably stay
        # within the 1e-5 comparison against the reference.
        inv = pl.reciprocal(denom, approx=False)
        for r in range(radix):
            out_slabs[r * cardinality + c] = exps[r] * inv
    out = jnp.concatenate(out_slabs, axis=1)      # (TB, C), already permuted
    o_ref[...] = out.astype(o_ref.dtype)          # single dense block store


def _sigmoid_kernel(x_ref, o_ref):
    x = x_ref[...].astype(jnp.float32)
    # exp on the EUP slot + explicit reciprocal (no literal VPU divide chain).
    o_ref[...] = pl.reciprocal(1.0 + jnp.exp(-x), approx=False).astype(o_ref.dtype)


def _tensorcores_per_chip():
    """Best-effort TensorCores per chip: 2 on v7x, 1 on v5e/v6e.

    Only used to decide whether to split a single-tile grid in two so the
    "parallel" grid axis can occupy both cores. Any failure defaults to 1,
    which is correct everywhere (just not maximally parallel on v7x).
    """
    try:
        info = pltpu.get_tpu_info()
        for attr in ("num_tensorcores", "tensorcore_count",
                     "num_cores_per_chip", "cores_per_chip"):
            val = getattr(info, attr, None)
            if isinstance(val, int) and val >= 2:
                return val
        ver = getattr(info, "chip_version", None)
        if ver is not None and "7" in str(ver):
            return 2
    except Exception:
        pass
    try:
        kind = str(getattr(jax.devices()[0], "device_kind", "")).lower()
        if "7" in kind:
            return 2
    except Exception:
        pass
    return 1


def _row_tile(batch, feat, itemsize):
    """Rows per grid step, sized against a conservative VMEM working set.

    Per-row cost counts the double-buffered input+output blocks *and* the f32
    intermediates: every (TB, rest) slab / exp temporary is lane-padded to 128
    lanes in vregs/VMEM, so with rest < 128 the temporaries dominate — budget
    ~12 full-row f32 equivalents per row (exact for rest=16, generous above).
    """
    per_row = 4 * feat * itemsize + 12 * feat * 4
    max_rows = max(8, _VMEM_WORKING_SET_BYTES // max(1, per_row))
    if batch <= max_rows:
        return batch                        # full-dim block (one grid step)
    return max(8, (max_rows // 8) * 8)      # (8,128)-aligned row tile


def _pick_row_tile(batch, feat, itemsize, override=None):
    if override is not None:
        return override
    tb = _row_tile(batch, feat, itemsize)
    # v7x: a grid of (1,) leaves the second TensorCore idle. When the batch is
    # big enough that the kernel is not purely overhead-bound, split into two
    # row tiles so dimension_semantics=("parallel",) shards across both TCs.
    if tb >= batch and batch >= 16 and _tensorcores_per_chip() >= 2:
        half = (batch + 1) // 2
        tb = max(8, ((half + 7) // 8) * 8)
    return tb


def radix_softmax(x, radix, cardinality, *, row_tile=None):
    """JAX/Pallas equivalent of RadixSoftmax.forward.

    x: NCHW array (B, C, H, W) (typically H = W = 1 in SplAt).
    Returns (B, C*H*W) when radix > 1, else sigmoid(x) with original shape.
    `row_tile` overrides the automatic row-tile size (testing / tuning only).
    """
    batch = x.shape[0]
    orig_shape = x.shape
    flat = x.reshape(batch, -1)     # metadata-only; no transpose, no HBM copy
    feat = flat.shape[1]
    itemsize = flat.dtype.itemsize
    tb = _pick_row_tile(batch, feat, itemsize, row_tile)
    grid = (pl.cdiv(batch, tb),)
    compiler_params = pltpu.CompilerParams(
        dimension_semantics=("parallel",),   # shard row tiles across TCs
        vmem_limit_bytes=_VMEM_LIMIT_BYTES,
    )
    in_specs = [pl.BlockSpec((tb, feat), lambda i: (i, 0))]
    out_specs = pl.BlockSpec((tb, feat), lambda i: (i, 0))

    if radix > 1:
        if feat % (cardinality * radix) != 0:
            raise ValueError(
                f"C*H*W = {feat} must be divisible by cardinality*radix = "
                f"{cardinality * radix}")
        rest = feat // (cardinality * radix)
        kernel = functools.partial(
            _radix_softmax_kernel, radix=radix, cardinality=cardinality,
            rest=rest)
        cost = pl.CostEstimate(
            flops=3 * batch * feat,           # max / sub / normalize, roughly
            transcendentals=batch * feat,     # one exp per element
            bytes_accessed=2 * batch * feat * itemsize)
        return pl.pallas_call(
            kernel,
            out_shape=jax.ShapeDtypeStruct((batch, feat), x.dtype),
            grid_spec=pl.GridSpec(grid=grid, in_specs=in_specs,
                                  out_specs=out_specs),
            compiler_params=compiler_params,
            cost_estimate=cost,
        )(flat)
    else:
        cost = pl.CostEstimate(
            flops=2 * batch * feat,
            transcendentals=batch * feat,
            bytes_accessed=2 * batch * feat * itemsize)
        out = pl.pallas_call(
            _sigmoid_kernel,
            out_shape=jax.ShapeDtypeStruct((batch, feat), x.dtype),
            grid_spec=pl.GridSpec(grid=grid, in_specs=in_specs,
                                  out_specs=out_specs),
            compiler_params=compiler_params,
            cost_estimate=cost,
        )(flat)
        return out.reshape(orig_shape)


def _reference_radix_softmax(x, radix, cardinality):
    batch = x.shape[0]
    if radix > 1:
        xr = x.reshape(batch, cardinality, radix, -1).transpose(0, 2, 1, 3)
        xr = jax.nn.softmax(xr, axis=1)
        return xr.reshape(batch, -1)
    return jax.nn.sigmoid(x)


if __name__ == "__main__":
    key = jax.random.PRNGKey(0)

    # 1) radix > 1 path: batch=2, cardinality=2, radix=4, rest=16 -> C = 128.
    radix, cardinality = 4, 2
    B, C = 2, cardinality * radix * 16
    x = jax.random.normal(key, (B, C, 1, 1), dtype=jnp.float32)
    out = jax.block_until_ready(radix_softmax(x, radix, cardinality))
    ref = _reference_radix_softmax(x, radix, cardinality)
    assert out.shape == (B, C)
    assert jnp.allclose(out, ref, atol=1e-5, rtol=1e-5)

    # 2) cardinality=1, radix=2, rest=32 -> C = 64 (feat < 128 lanes).
    k1 = jax.random.PRNGKey(2)
    x_b = jax.random.normal(k1, (2, 64, 1, 1), dtype=jnp.float32)
    out_b = jax.block_until_ready(radix_softmax(x_b, 2, 1))
    ref_b = _reference_radix_softmax(x_b, 2, 1)
    assert out_b.shape == (2, 64)
    assert jnp.allclose(out_b, ref_b, atol=1e-5, rtol=1e-5)

    # 3) radix == 1 path (sigmoid), original shape preserved.
    key2 = jax.random.PRNGKey(1)
    x1 = jax.random.normal(key2, (B, 64, 1, 1), dtype=jnp.float32)
    out1 = jax.block_until_ready(radix_softmax(x1, 1, cardinality))
    ref1 = _reference_radix_softmax(x1, 1, cardinality)
    assert out1.shape == x1.shape
    assert jnp.allclose(out1, ref1, atol=1e-5, rtol=1e-5)

    # 4) Multi-tile grid with a partial (masked) last row tile: batch=20 with a
    #    forced 8-row tile -> grid=(3,), last tile has 4 valid + 4 padded rows.
    k3 = jax.random.PRNGKey(3)
    x_c = jax.random.normal(k3, (20, 128, 1, 1), dtype=jnp.float32)
    out_c = jax.block_until_ready(radix_softmax(x_c, 2, 2, row_tile=8))
    ref_c = _reference_radix_softmax(x_c, 2, 2)
    assert out_c.shape == (20, 128)
    assert jnp.allclose(out_c, ref_c, atol=1e-5, rtol=1e-5)

    print("KERNEL_OK")
</pallas_src>

<mosaic_0001>
module attributes {stable_mosaic.version = 11 : i64} {
  func.func @_radix_softmax_kernel(%arg0: i32, %arg1: memref<2x128xf32, #tpu.memory_space<vmem>>, %arg2: memref<2x128xf32, #tpu.memory_space<vmem>>) attributes {dimension_semantics = [#tpu.dimension_semantics<parallel>], iteration_bounds = array<i64: 1>, scalar_prefetch = 0 : i64, scratch_operands = 0 : i64, tpu.core_type = #tpu.core_type<tc>, window_params = [{transform_indices = @transform_0, window_bounds = array<i64: 2, 128>}, {transform_indices = @transform_1, window_bounds = array<i64: 2, 128>}]} {
    %c0 = arith.constant 0 : index
    %c0_0 = arith.constant 0 : index
    %0 = vector.load %arg1[%c0, %c0_0] : memref<2x128xf32, #tpu.memory_space<vmem>>, vector<2x128xf32>
    %1 = vector.extract_strided_slice %0 {offsets = [0, 0], sizes = [2, 16], strides = [1, 1]} : vector<2x128xf32> to vector<2x16xf32>
    %2 = vector.extract_strided_slice %0 {offsets = [0, 16], sizes = [2, 16], strides = [1, 1]} : vector<2x128xf32> to vector<2x16xf32>
    %3 = vector.extract_strided_slice %0 {offsets = [0, 32], sizes = [2, 16], strides = [1, 1]} : vector<2x128xf32> to vector<2x16xf32>
    %4 = vector.extract_strided_slice %0 {offsets = [0, 48], sizes = [2, 16], strides = [1, 1]} : vector<2x128xf32> to vector<2x16xf32>
    %5 = arith.maximumf %1, %2 : vector<2x16xf32>
    %6 = arith.maximumf %5, %3 : vector<2x16xf32>
    %7 = arith.maximumf %6, %4 : vector<2x16xf32>
    %8 = arith.subf %1, %7 : vector<2x16xf32>
    %9 = math.exp %8 : vector<2x16xf32>
    %10 = arith.subf %2, %7 : vector<2x16xf32>
    %11 = math.exp %10 : vector<2x16xf32>
    %12 = arith.subf %3, %7 : vector<2x16xf32>
    %13 = math.exp %12 : vector<2x16xf32>
    %14 = arith.subf %4, %7 : vector<2x16xf32>
    %15 = math.exp %14 : vector<2x16xf32>
    %16 = arith.addf %9, %11 : vector<2x16xf32>
    %17 = arith.addf %16, %13 : vector<2x16xf32>
    %18 = arith.addf %17, %15 : vector<2x16xf32>
    %19 = tpu.reciprocal %18 : vector<2x16xf32> -> vector<2x16xf32>
    %20 = arith.mulf %9, %19 : vector<2x16xf32>
    %21 = arith.mulf %11, %19 : vector<2x16xf32>
    %22 = arith.mulf %13, %19 : vector<2x16xf32>
    %23 = arith.mulf %15, %19 : vector<2x16xf32>
    %24 = vector.extract_strided_slice %0 {offsets = [0, 64], sizes = [2, 16], strides = [1, 1]} : vector<2x128xf32> to vector<2x16xf32>
    %25 = vector.extract_strided_slice %0 {offsets = [0, 80], sizes = [2, 16], strides = [1, 1]} : vector<2x128xf32> to vector<2x16xf32>
    %26 = vector.extract_strided_slice %0 {offsets = [0, 96], sizes = [2, 16], strides = [1, 1]} : vector<2x128xf32> to vector<2x16xf32>
    %27 = vector.extract_strided_slice %0 {offsets = [0, 112], sizes = [2, 16], strides = [1, 1]} : vector<2x128xf32> to vector<2x16xf32>
    %28 = arith.maximumf %24, %25 : vector<2x16xf32>
    %29 = arith.maximumf %28, %26 : vector<2x16xf32>
    %30 = arith.maximumf %29, %27 : vector<2x16xf32>
    %31 = arith.subf %24, %30 : vector<2x16xf32>
    %32 = math.exp %31 : vector<2x16xf32>
    %33 = arith.subf %25, %30 : vector<2x16xf32>
    %34 = math.exp %33 : vector<2x16xf32>
    %35 = arith.subf %26, %30 : vector<2x16xf32>
    %36 = math.exp %35 : vector<2x16xf32>
    %37 = arith.subf %27, %30 : vector<2x16xf32>
    %38 = math.exp %37 : vector<2x16xf32>
    %39 = arith.addf %32, %34 : vector<2x16xf32>
    %40 = arith.addf %39, %36 : vector<2x16xf32>
    %41 = arith.addf %40, %38 : vector<2x16xf32>
    %42 = tpu.reciprocal %41 : vector<2x16xf32> -> vector<2x16xf32>
    %43 = arith.mulf %32, %42 : vector<2x16xf32>
    %44 = arith.mulf %34, %42 : vector<2x16xf32>
    %45 = arith.mulf %36, %42 : vector<2x16xf32>
    %46 = arith.mulf %38, %42 : vector<2x16xf32>
    %47 = tpu.concatenate %20, %43, %21, %44, %22, %45, %23, %46 in 1 : vector<2x16xf32>, vector<2x16xf32>, vector<2x16xf32>, vector<2x16xf32>, vector<2x16xf32>, vector<2x16xf32>, vector<2x16xf32>, vector<2x16xf32> -> vector<2x128xf32>
    %c0_1 = arith.constant 0 : index
    %c0_2 = arith.constant 0 : index
    %48 = vector.load %arg2[%c0_1, %c0_2] : memref<2x128xf32, #tpu.memory_space<vmem>>, vector<2x128xf32>
    tpu.vector_store %arg2[%c0_1, %c0_2], %47 {strides = array<i32>} : memref<2x128xf32, #tpu.memory_space<vmem>>, vector<2x128xf32>,
    return
  }
  func.func @transform_0(%arg0: i32) -> (i32, i32) {
    %c0_i32 = arith.constant 0 : i32
    %c0_i32_0 = arith.constant 0 : i32
    return %arg0, %c0_i32 : i32, i32
  }
  func.func @transform_1(%arg0: i32) -> (i32, i32) {
    %c0_i32 = arith.constant 0 : i32
    %c0_i32_0 = arith.constant 0 : i32
    return %arg0, %c0_i32 : i32, i32
  }
}

</mosaic_0001>

<bundles_post_ra>
// kernel: tpu_custom_call.1
= control target key start
LH: loop header
LB: loop body
LE: loop exit
PB: predicated region body
PF: predicated region fallthrough
CT: control target
= control target key end

     0   :  { %6 = vsyncpa [#allocation3], 0  ;;  %s268_s0 = inlined_call_operand.hbm [shape: f32[2,128], index: 0, kind: input, shape index: {}]   ;;  %s269_s1 = inlined_call_operand.hbm [shape: f32[2,128], index: 1, kind: output, shape index: {}]  }
   0x1   :  { %7 = vsyncpa [#allocation4], 0  ;;  %s13_s8 = sshll.u32 %s268_s0, 4  ;;  %s226_s9 = smov [#allocation2]   ;;  %s14_s8 = int_to_ptr.hbm [resolvable:$true] %s13_s8 }
   0x2   :  { %s15_s10 = sshll.u32 %s226_s9, 4  ;;  %s16_s10 = int_to_ptr.vmem [resolvable:$true] %s15_s10 }
   0x3   :  { %18 = dma.hbm_to_vmem [thread:$0]  %s14_s8, 32, %s16_s10, [#allocation3]  }
   0x4   :  { %222 = dma.done.wait [#allocation3], 32  }
   0x5   :  { %223 = vsyncadd [#allocation3], 4294967264  ;;  %v23_v0 = vld [vmem:[#allocation2] sm:$0x3]  ;;  %s227_s11 = smov 112   ;;  %s228_s12 = smov 80  }
   0x6   :  { %25 = vrot.lane.b32.xlu0 %v23_v0, %s227_s11  ;;  %33 = vrot.lane.b32.xlu1 %v23_v0, %s228_s12  ;;  %s229_s13 = smov 96   ;;  %s230_s0 = smov 32   ;;  %vm124_vm4 = vcmask 130048   ;;  %vm126_vm5 = vcmask 261120   ;;  %vm128_vm6 = vcmask 392192   ;;  %vm130_vm7 = vcmask 523264  }
   0x7   :  { %s231_s14 = smov 16   ;;  %s232_s15 = smov 48   ;;  %vm132_vm8 = vcmask 654336   ;;  %vm134_vm9 = vcmask 785408   ;;  %vm136_vm10 = vcmask 916480  }
   0x8   :  { %s233_s16 = smov [#allocation5]   ;;  %s146_s20 = sshll.u32 %s269_s1, 4  ;;  %s147_s20 = int_to_ptr.hbm [resolvable:$true] %s146_s20 }
   0x9   :  { %s144_s17 = sshll.u32 %s233_s16, 4  ;;  %s145_s17 = int_to_ptr.vmem [resolvable:$true] %s144_s17 }
   0xe   :  { %29 = vrot.lane.b32.xlu0 %v23_v0, %s229_s13 }
  0x78   :  { %v26_v1 = vpop.permute.xlu0 %25  ;;  %v34_v4 = vpop.permute.xlu1 %33 }
  0x79   :  { %v28_v2 = vmax.f32 %v23_v0, %v26_v1 }
  0x80   :  { %v30_v3 = vpop.permute.xlu0 %29 }
  0x81   :  { %v32_v5 = vmax.f32 %v28_v2, %v30_v3 }
  0x83   :  { %v36_v6 = vmax.f32 %v32_v5, %v34_v4 }
  0x85   :  { %47 = vrot.lane.b32.xlu2 %v36_v6, %s230_s0  ;;  %41 = vrot.lane.b32.xlu1 %v36_v6, %s231_s14  ;;  %v37_v19 = vsub.f32 %v23_v0, %v36_v6 }
  0x87   :  { %v38_v20 = vmul.f32 1.442695, %v37_v19 }
  0x8d   :  { %53 = vrot.lane.b32.xlu2 %v36_v6, %s232_s15 }
  0xdf   :  { %v48_v7 = vpop.permute.xlu2 %47 }
  0xe0   :  { %v50_v8 = vsub.f32 %v23_v0, %v48_v7 }
  0xe2   :  { %v51_v9 = vmul.f32 1.442695, %v50_v8 }
  0xe4   :  { %164 = vpow2.f32 %v51_v9 }
  0xe7   :  { %v54_v10 = vpop.permute.xlu2 %53 }
  0xe8   :  { %v56_v11 = vsub.f32 %v23_v0, %v54_v10 }
  0xea   :  { %v165_v12 = vpop.eup %164  ;;  %v57_v13 = vmul.f32 1.442695, %v56_v11 }
  0xeb   :  { %65 = vrot.lane.b32.xlu1 %v165_v12, %s229_s13 }
  0xec   :  { %166 = vpow2.f32 %v57_v13 }
  0xf2   :  { %v167_v14 = vpop.eup %166 }
  0xf3   :  { %70 = vrot.lane.b32.xlu2 %v167_v14, %s228_s12 }
  0xf7   :  { %v42_v15 = vpop.permute.xlu1 %41 }
  0xf8   :  { %v44_v16 = vsub.f32 %v23_v0, %v42_v15 }
  0xfa   :  { %v45_v17 = vmul.f32 1.442695, %v44_v16 }
  0xfc   :  { %168 = vpow2.f32 %v45_v17 }
  0xfd   :  { %170 = vpow2.f32 %v38_v20 }
 0x102   :  { %v169_v18 = vpop.eup %168 }
 0x103   :  { %60 = vrot.lane.b32.xlu0 %v169_v18, %s227_s11  ;;  %v171_v21 = vpop.eup %170 }
 0x14d   :  { %v71_v26 = vpop.permute.xlu2 %70 }
 0x15d   :  { %v66_v24 = vpop.permute.xlu1 %65 }
 0x175   :  { %v61_v22 = vpop.permute.xlu0 %60 }
 0x176   :  { %v63_v23 = vadd.f32 %v171_v21, %v61_v22 }
 0x178   :  { %v68_v25 = vadd.f32 %v66_v24, %v63_v23 }
 0x17a   :  { %v73_v27 = vadd.f32 %v71_v26, %v68_v25 }
 0x17c   :  { %172 = vrcp.f32 %v73_v27  ;;  %v85_v31 = vand.u32 2147483648, %v73_v27  ;;  %v83_v33 = vand.u32 2147483647, %v73_v27  ;;  %vm79_vm1 = vweird.f32 %v73_v27 }
 0x17e   :  { %v86_v35 = vor.u32 1.1754944e-38, %v85_v31  ;;  %vm84_vm3 = vcmp.eq.f32.partialorder %v83_v33, 8.507059e+37 }
 0x182   :  { %v173_v28 = vpop.eup %172 }
 0x183   :  { %v75_v29 = vmul.f32 %v173_v28, %v73_v27  ;;  %vm80_vm0 = vweird.f32 %v173_v28 }
 0x184   :  { %vm81_vm2 = vmor %vm79_vm1, %vm80_vm0 }
 0x185   :  { %v76_v30 = vsub.f32 1.0, %v75_v29 }
 0x187   :  { %v77_v32 = vmul.f32 %v173_v28, %v76_v30 }
 0x189   :  { %v78_v34 = vadd.f32 %v173_v28, %v77_v32 }
 0x18b   :  { %v82_v36 = vsel %vm81_vm2, %v173_v28, %v78_v34 }
 0x18c   :  { %v87_v37 = vsel %vm84_vm3, %v86_v35, %v82_v36 }
 0x18d   :  { %98 = vrot.lane.b32.xlu2 %v87_v37, %s232_s15  ;;  %94 = vrot.lane.b32.xlu1 %v87_v37, %s230_s0  ;;  %v88_v38 = vmul.f32 %v171_v21, %v87_v37 }
 0x18e   :  { %90 = vrot.lane.b32.xlu0 %v87_v37, %s231_s14 }
 0x196   :  { %103 = vrot.lane.b32.xlu0 %v88_v38, %s228_s12 }
 0x1e7   :  { %v99_v43 = vpop.permute.xlu2 %98 }
 0x1e8   :  { %v101_v44 = vmul.f32 %v167_v14, %v99_v43 }
 0x1ff   :  { %v95_v39 = vpop.permute.xlu1 %94 }
 0x200   :  { %v97_v40 = vmul.f32 %v165_v12, %v95_v39  ;;  %v91_v41 = vpop.permute.xlu0 %90 }
 0x201   :  { %v93_v42 = vmul.f32 %v169_v18, %v91_v41 }
 0x202   :  { %114 = vrot.lane.b32.xlu0 %v97_v40, %s230_s0 }
 0x203   :  { %110 = vrot.lane.b32.xlu2 %v93_v42, %s229_s13  ;;  %107 = vrot.lane.b32.xlu1 %v93_v42, %s231_s14 }
 0x208   :  { %v104_v45 = vpop.permute.xlu0 %103 }
 0x209   :  { %v125_v48 = vsel %vm124_vm4, %v88_v38, %v104_v45 }
 0x20b   :  { %121 = vrot.lane.b32.xlu2 %v101_v44, %s232_s15  ;;  %117 = vrot.lane.b32.xlu1 %v97_v40, %s227_s11 }
 0x25d   :  { %v111_v46 = vpop.permute.xlu2 %110 }
 0x265   :  { %v122_v54 = vpop.permute.xlu2 %121 }
 0x274   :  { %v115_v51 = vpop.permute.xlu0 %114 }
 0x275   :  { %v108_v47 = vpop.permute.xlu1 %107 }
 0x276   :  { %v127_v49 = vsel %vm126_vm5, %v125_v48, %v108_v47 }
 0x277   :  { %v129_v50 = vsel %vm128_vm6, %v127_v49, %v111_v46 }
 0x278   :  { %v131_v52 = vsel %vm130_vm7, %v129_v50, %v115_v51 }
 0x27d   :  { %v118_v53 = vpop.permute.xlu1 %117 }
 0x27e   :  { %v133_v55 = vsel %vm132_vm8, %v131_v52, %v118_v53 }
 0x27f   :  { %v135_v56 = vsel %vm134_vm9, %v133_v55, %v122_v54 }
 0x280   :  { %v137_v57 = vsel %vm136_vm10, %v135_v56, %v101_v44 }
 0x281   :  { %138 = vst [vmem:[#allocation5] sm:$0x3] %v137_v57 }
 0x282   :  { %149 = dma.vmem_to_hbm [thread:$0]  %s145_s17, 32, %s147_s20, [#allocation4]  }
 0x283   :  { %224 = dma.done.wait [#allocation4], 32  }
 0x284   :  { %225 = vsyncadd [#allocation4], 4294967264 }
 0x285   :  { %154 = vsyncpa [#allocation3], 1 }
 0x286   :  { %155 = vsyncpa [#allocation4], 1 }

</bundles_post_ra>
